<compile_context>
chip_gen: v5e
topology: v5e:2x2
jax: 0.10.0
libtpu: 0.0.40
codegen_flags: <defaults>
</compile_context>

<pallas_src>
import math

import jax
import jax.numpy as jnp
from jax.experimental import pallas as pl
from jax.experimental.pallas import tpu as pltpu

C_IN, C_OUT, K, N_CLASSES = 4, 16, 3, 10
CLS_PAD = 128            # lane-dense head output; real classes sliced in wrapper
ROW_TILE_CAP = 2048      # max conv rows per grid step (fits every generation's VMEM)


def fused_conv_pool_fc_kernel(p_ref, wc_ref, bc_ref, wfc_ref, bfc_ref,
                              o_ref, acc_ref):
    """One grid step = one row-tile of one image.

    p_ref   : (1, TM, KP)       bf16  im2col patches for this tile
    wc_ref  : (KP, C_OUT)       bf16  conv weight as a matmul operand
    bc_ref  : (1, C_OUT)        f32   conv bias
    wfc_ref : (C_OUT, CLS_PAD)  f32   fc weight, pre-scaled by 1/HW (mean folded in)
    bfc_ref : (1, CLS_PAD)      f32   fc bias (zero-padded to 128 lanes)
    o_ref   : (1, 1, CLS_PAD)   f32   per-image logits (written on the last tile)
    acc_ref : (1, C_OUT)        f32   per-image pooled-sum accumulator (scratch)
    """
    t = pl.program_id(1)

    @pl.when(t == 0)
    def _init():
        acc_ref[...] = jnp.zeros_like(acc_ref)

    # conv as matmul on this row tile: bf16 MXU inputs, f32 accumulation.
    h = jnp.dot(p_ref[0], wc_ref[...], preferred_element_type=jnp.float32)
    h = jnp.maximum(h + bc_ref[...], 0.0)                 # bias + ReLU in f32

    # partial global-average-pool: accumulate per-image channel sums per tile.
    acc_ref[...] += jnp.sum(h, axis=0, keepdims=True)

    @pl.when(t == pl.num_programs(1) - 1)
    def _finalize():
        # 1/HW is pre-folded into wfc on the host => mean-pool + linear head.
        logits = jnp.dot(acc_ref[...], wfc_ref[...],
                         preferred_element_type=jnp.float32) + bfc_ref[...]
        o_ref[...] = logits[None, :, :]


def _pick_row_tile(hw):
    """Largest divisor of HW that is <= ROW_TILE_CAP (and 8-aligned if partial)."""
    tm = math.gcd(hw, ROW_TILE_CAP)
    if tm != hw and tm % 8 != 0:
        tm = hw            # fall back: one whole image per grid step
    return tm


def vanilla_model_v2_forward(x_nchw, params):
    w_conv, b_conv, w_fc, b_fc = params
    N, C, H, W = x_nchw.shape
    HW, KP = H * W, K * K * C

    # ---- host-side glue: im2col patch extraction (NCHW -> NHWC -> patches) ----
    # Kept at KP=36 columns (no pad to 128) and cast to bf16: ~7x less patch HBM
    # traffic than a 128-wide f32 slab.  (The residual 9x im2col duplication could
    # be removed with 9 shifted in-kernel matmuls; negligible at these sizes.)
    x = jnp.transpose(x_nchw, (0, 2, 3, 1))                       # NHWC
    xp = jnp.pad(x, ((0, 0), (1, 1), (1, 1), (0, 0)))             # padding=1
    cols = [xp[:, kh:kh + H, kw:kw + W, :]
            for kh in range(K) for kw in range(K)]                # 9 x (N,H,W,C)
    patches = jnp.stack(cols, axis=3).reshape(N, HW, KP).astype(jnp.bfloat16)

    # conv weight (C_out, C_in, KH, KW) -> (KH*KW*C_in, C_out), bf16 for the MXU
    w_mat = (jnp.transpose(w_conv, (2, 3, 1, 0))
             .reshape(KP, C_OUT).astype(jnp.bfloat16))
    b_mat = b_conv.reshape(1, C_OUT).astype(jnp.float32)

    # fc weight (num_classes, C_out) -> (C_out, CLS_PAD); fold 1/HW of the mean
    # pool into the weight; keep the tiny head in f32 for precision.
    w_fc_mat = jnp.pad(w_fc.T.astype(jnp.float32) / float(HW),
                       ((0, 0), (0, CLS_PAD - N_CLASSES)))
    b_fc_mat = jnp.pad(b_fc.astype(jnp.float32),
                       (0, CLS_PAD - N_CLASSES)).reshape(1, CLS_PAD)

    TM = _pick_row_tile(HW)
    n_row_tiles = HW // TM

    grid_spec = pltpu.PrefetchScalarGridSpec(
        num_scalar_prefetch=0,
        grid=(N, n_row_tiles),                    # batch parallel, row tiles arbitrary
        in_specs=[
            pl.BlockSpec((1, TM, KP), lambda n, t: (n, t, 0)),
            pl.BlockSpec((KP, C_OUT), lambda n, t: (0, 0)),
            pl.BlockSpec((1, C_OUT), lambda n, t: (0, 0)),
            pl.BlockSpec((C_OUT, CLS_PAD), lambda n, t: (0, 0)),
            pl.BlockSpec((1, CLS_PAD), lambda n, t: (0, 0)),
        ],
        out_specs=pl.BlockSpec((1, 1, CLS_PAD), lambda n, t: (n, 0, 0)),
        scratch_shapes=[pltpu.VMEM((1, C_OUT), jnp.float32)],
    )

    cost = pl.CostEstimate(
        flops=2 * N * HW * KP * C_OUT + 2 * N * C_OUT * CLS_PAD,
        transcendentals=0,
        bytes_accessed=(patches.size * patches.dtype.itemsize
                        + w_mat.size * w_mat.dtype.itemsize
                        + b_mat.size * 4 + w_fc_mat.size * 4 + b_fc_mat.size * 4
                        + N * CLS_PAD * 4),
    )

    logits_p = pl.pallas_call(
        fused_conv_pool_fc_kernel,
        out_shape=jax.ShapeDtypeStruct((N, 1, CLS_PAD), jnp.float32),
        grid_spec=grid_spec,
        compiler_params=pltpu.CompilerParams(
            dimension_semantics=("parallel", "arbitrary")),
        cost_estimate=cost,
    )(patches, w_mat, b_mat, w_fc_mat, b_fc_mat)

    return logits_p[:, 0, :N_CLASSES]


def init_params(key):
    k1, k2, k3, k4 = jax.random.split(key, 4)
    w_conv = jax.random.normal(k1, (C_OUT, C_IN, K, K), jnp.float32) * 0.1
    b_conv = jax.random.normal(k2, (C_OUT,), jnp.float32) * 0.01
    w_fc = jax.random.normal(k3, (N_CLASSES, C_OUT), jnp.float32) * 0.1
    b_fc = jax.random.normal(k4, (N_CLASSES,), jnp.float32) * 0.01
    return w_conv, b_conv, w_fc, b_fc


if __name__ == "__main__":
    root = jax.random.PRNGKey(0)
    k_params, k_x = jax.random.split(root)
    params = init_params(k_params)
    x = jax.random.normal(k_x, (2, 4, 16, 16), jnp.float32)   # NCHW, like PyTorch

    out = vanilla_model_v2_forward(x, params)
    jax.block_until_ready(out)
    assert out.shape == (2, N_CLASSES) and out.dtype == jnp.float32
    print("KERNEL_OK")
</pallas_src>

<mosaic_0001>
module attributes {stable_mosaic.version = 11 : i64} {
  func.func @fused_conv_pool_fc_kernel(%arg0: i32, %arg1: i32, %arg2: memref<1x256x36xbf16, #tpu.memory_space<vmem>>, %arg3: memref<36x16xbf16, #tpu.memory_space<vmem>>, %arg4: memref<1x16xf32, #tpu.memory_space<vmem>>, %arg5: memref<16x128xf32, #tpu.memory_space<vmem>>, %arg6: memref<1x128xf32, #tpu.memory_space<vmem>>, %arg7: memref<1x1x128xf32, #tpu.memory_space<vmem>>, %arg8: memref<1x16xf32, #tpu.memory_space<vmem>>) attributes {dimension_semantics = [#tpu.dimension_semantics<parallel>, #tpu.dimension_semantics<arbitrary>], iteration_bounds = array<i64: 2, 1>, scalar_prefetch = 0 : i64, scratch_operands = 1 : i64, tpu.core_type = #tpu.core_type<tc>, window_params = [{transform_indices = @transform_0, window_bounds = array<i64: 1, 256, 36>}, {pipeline_mode = #tpu.pipeline_mode<synchronous>, transform_indices = @transform_1, window_bounds = array<i64: 36, 16>}, {pipeline_mode = #tpu.pipeline_mode<synchronous>, transform_indices = @transform_2, window_bounds = array<i64: 1, 16>}, {pipeline_mode = #tpu.pipeline_mode<synchronous>, transform_indices = @transform_3, window_bounds = array<i64: 16, 128>}, {pipeline_mode = #tpu.pipeline_mode<synchronous>, transform_indices = @transform_4, window_bounds = array<i64: 1, 128>}, {transform_indices = @transform_5, window_bounds = array<i64: 1, 1, 128>}]} {
    %c0_i32 = arith.constant 0 : i32
    %0 = arith.cmpi eq, %arg1, %c0_i32 : i32
    %1 = arith.extui %0 : i1 to i32
    %c0_i32_0 = arith.constant 0 : i32
    %2 = arith.cmpi ne, %1, %c0_i32_0 : i32
    scf.if %2 {
      %cst_15 = arith.constant 0.000000e+00 : f32
      %20 = vector.broadcast %cst_15 : f32 to vector<1x16xf32>
      %c0_16 = arith.constant 0 : index
      %c0_17 = arith.constant 0 : index
      %21 = vector.load %arg8[%c0_16, %c0_17] : memref<1x16xf32, #tpu.memory_space<vmem>>, vector<1x16xf32>
      tpu.vector_store %arg8[%c0_16, %c0_17], %20 {strides = array<i32>} : memref<1x16xf32, #tpu.memory_space<vmem>>, vector<1x16xf32>,
    } else {
    }
    %c0 = arith.constant 0 : index
    %c0_1 = arith.constant 0 : index
    %c0_2 = arith.constant 0 : index
    %3 = vector.load %arg2[%c0, %c0_1, %c0_2] : memref<1x256x36xbf16, #tpu.memory_space<vmem>>, vector<1x256x36xbf16>
    %4 = vector.shape_cast %3 : vector<1x256x36xbf16> to vector<256x36xbf16>
    %c0_3 = arith.constant 0 : index
    %c0_4 = arith.constant 0 : index
    %5 = vector.load %arg3[%c0_3, %c0_4] : memref<36x16xbf16, #tpu.memory_space<vmem>>, vector<36x16xbf16>
    %cst = arith.constant dense<0.000000e+00> : vector<256x16xf32>
    %6 = tpu.matmul %4, %5, %cst {dimension_numbers = #tpu.dot_dimension_numbers<[1], [0], [0], [1], [0, 0, 1, 1], [], []>} : vector<256x36xbf16>, vector<36x16xbf16>, vector<256x16xf32> -> vector<256x16xf32>
    %c0_5 = arith.constant 0 : index
    %c0_6 = arith.constant 0 : index
    %7 = vector.load %arg4[%c0_5, %c0_6] : memref<1x16xf32, #tpu.memory_space<vmem>>, vector<1x16xf32>
    %8 = vector.broadcast %7 : vector<1x16xf32> to vector<256x16xf32>
    %9 = arith.addf %6, %8 : vector<256x16xf32>
    %cst_7 = arith.constant 0.000000e+00 : f32
    %10 = vector.broadcast %cst_7 : f32 to vector<256x16xf32>
    %11 = arith.maximumf %9, %10 : vector<256x16xf32>
    %c0_8 = arith.constant 0 : index
    %c0_9 = arith.constant 0 : index
    %12 = vector.load %arg8[%c0_8, %c0_9] : memref<1x16xf32, #tpu.memory_space<vmem>>, vector<1x16xf32>
    %cst_10 = arith.constant dense<0.000000e+00> : vector<16xf32>
    %13 = vector.multi_reduction <add>, %11, %cst_10 [0] : vector<256x16xf32> to vector<16xf32>
    %14 = vector.shape_cast %13 : vector<16xf32> to vector<1x16xf32>
    %15 = arith.addf %12, %14 : vector<1x16xf32>
    %c0_11 = arith.constant 0 : index
    %c0_12 = arith.constant 0 : index
    %16 = vector.load %arg8[%c0_11, %c0_12] : memref<1x16xf32, #tpu.memory_space<vmem>>, vector<1x16xf32>
    tpu.vector_store %arg8[%c0_11, %c0_12], %15 {strides = array<i32>} : memref<1x16xf32, #tpu.memory_space<vmem>>, vector<1x16xf32>,
    %c0_i32_13 = arith.constant 0 : i32
    %17 = arith.cmpi eq, %arg1, %c0_i32_13 : i32
    %18 = arith.extui %17 : i1 to i32
    %c0_i32_14 = arith.constant 0 : i32
    %19 = arith.cmpi ne, %18, %c0_i32_14 : i32
    scf.if %19 {
      %c0_15 = arith.constant 0 : index
      %c0_16 = arith.constant 0 : index
      %20 = vector.load %arg8[%c0_15, %c0_16] : memref<1x16xf32, #tpu.memory_space<vmem>>, vector<1x16xf32>
      %c0_17 = arith.constant 0 : index
      %c0_18 = arith.constant 0 : index
      %21 = vector.load %arg5[%c0_17, %c0_18] : memref<16x128xf32, #tpu.memory_space<vmem>>, vector<16x128xf32>
      %cst_19 = arith.constant dense<0.000000e+00> : vector<1x128xf32>
      %22 = tpu.matmul %20, %21, %cst_19 {dimension_numbers = #tpu.dot_dimension_numbers<[1], [0], [0], [1], [0, 0, 1, 1], [], []>} : vector<1x16xf32>, vector<16x128xf32>, vector<1x128xf32> -> vector<1x128xf32>
      %c0_20 = arith.constant 0 : index
      %c0_21 = arith.constant 0 : index
      %23 = vector.load %arg6[%c0_20, %c0_21] : memref<1x128xf32, #tpu.memory_space<vmem>>, vector<1x128xf32>
      %24 = arith.addf %22, %23 : vector<1x128xf32>
      %25 = vector.shape_cast %24 : vector<1x128xf32> to vector<1x1x128xf32>
      %c0_22 = arith.constant 0 : index
      %c0_23 = arith.constant 0 : index
      %c0_24 = arith.constant 0 : index
      %26 = vector.load %arg7[%c0_22, %c0_23, %c0_24] : memref<1x1x128xf32, #tpu.memory_space<vmem>>, vector<1x1x128xf32>
      tpu.vector_store %arg7[%c0_22, %c0_23, %c0_24], %25 {strides = array<i32>} : memref<1x1x128xf32, #tpu.memory_space<vmem>>, vector<1x1x128xf32>,
    } else {
    }
    return
  }
  func.func @transform_0(%arg0: i32, %arg1: i32) -> (i32, i32, i32) {
    %c0_i32 = arith.constant 0 : i32
    %c0_i32_0 = arith.constant 0 : i32
    return %arg0, %arg1, %c0_i32 : i32, i32, i32
  }
  func.func @transform_1(%arg0: i32, %arg1: i32) -> (i32, i32) {
    %c0_i32 = arith.constant 0 : i32
    %c0_i32_0 = arith.constant 0 : i32
    %c0_i32_1 = arith.constant 0 : i32
    return %c0_i32, %c0_i32_0 : i32, i32
  }
  func.func @transform_2(%arg0: i32, %arg1: i32) -> (i32, i32) {
    %c0_i32 = arith.constant 0 : i32
    %c0_i32_0 = arith.constant 0 : i32
    %c0_i32_1 = arith.constant 0 : i32
    return %c0_i32, %c0_i32_0 : i32, i32
  }
  func.func @transform_3(%arg0: i32, %arg1: i32) -> (i32, i32) {
    %c0_i32 = arith.constant 0 : i32
    %c0_i32_0 = arith.constant 0 : i32
    %c0_i32_1 = arith.constant 0 : i32
    return %c0_i32, %c0_i32_0 : i32, i32
  }
  func.func @transform_4(%arg0: i32, %arg1: i32) -> (i32, i32) {
    %c0_i32 = arith.constant 0 : i32
    %c0_i32_0 = arith.constant 0 : i32
    %c0_i32_1 = arith.constant 0 : i32
    return %c0_i32, %c0_i32_0 : i32, i32
  }
  func.func @transform_5(%arg0: i32, %arg1: i32) -> (i32, i32, i32) {
    %c0_i32 = arith.constant 0 : i32
    %c0_i32_0 = arith.constant 0 : i32
    %c0_i32_1 = arith.constant 0 : i32
    return %arg0, %c0_i32, %c0_i32_0 : i32, i32, i32
  }
}

</mosaic_0001>

<bundles_post_ra>
// kernel: tpu_custom_call.1
= control target key start
LH: loop header
LB: loop body
LE: loop exit
PB: predicated region body
PF: predicated region fallthrough
CT: control target
= control target key end

     0   :  { %10 = vsyncpa [#allocation4], 0  ;;  %s1305_s0 = inlined_call_operand.vmem [shape: bf16[2,256,36], index: 0, kind: input, shape index: {}]   ;;  %s1306_s1 = inlined_call_operand.vmem [shape: bf16[36,16], index: 1, kind: input, shape index: {}]   ;;  %s1307_s2 = inlined_call_operand.vmem [shape: f32[1,16], index: 2, kind: input, shape index: {}]   ;;  %s1308_s3 = inlined_call_operand.vmem [shape: f32[16,128], index: 3, kind: input, shape index: {}]   ;;  %s1309_s4 = inlined_call_operand.vmem [shape: f32[1,128], index: 4, kind: input, shape index: {}]   ;;  %s1310_s5 = inlined_call_operand.hbm [shape: f32[2,1,128], index: 5, kind: output, shape index: {}]  }
   0x1   :  { %12 = vsyncpa [#allocation4 + $0x1], 0  ;;  %s1048_s18 = smov 0   ;;  %s1050_s19 = smov 0  }
   0x2   :  { %s1052_s20 = smov 0   ;;  %s1054_s21 = smov 0  }
   0x3   :  { %s1056_s22 = smov 0   ;;  %s1058_s23 = smov 0  }
   0x4 LB: > { %s754_s24 = sadd.s32 4294967295, %s1015_s23   ;;  %s755_s25 = sadd.s32 4294967294, %s1015_s23   ;;  %s1015_s23 = sphi %s1058_s23, %s18_s23   ;;  %s1011_s22 = sphi %s1056_s22, %s1317_s22   ;;  %s1007_s21 = sphi %s1054_s21, %s1316_s21   ;;  %s1003_s20 = sphi %s1052_s20, %s1315_s20   ;;  %s999_s19 = sphi %s1050_s19, %s1314_s19   ;;  %s995_s18 = sphi %s1048_s18, %s1313_s18  }
   0x5   : > { %s30_s26 = sadd.s32 1, %s1011_s22  ;;  %s149_s27 = sadd.s32 1, %s1003_s20 }
   0x6   : > { %p32_p0 = scmp.ge.s32.totalorder %s30_s26, 2  ;;  %p159_p1 = scmp.ne.s32.totalorder %s1003_s20, %s999_s19 }
   0x7   : > { %p160_p2 = scmp.eq.s32.totalorder %s754_s24, 1  ;;  %p165_p3 = scmp.ne.s32.totalorder %s999_s19, %s995_s18 }
   0x8   : > { %s1319_s26 = smov (%p32_p0, %s30_s26), 0  ;;  %p166_p5 = scmp.eq.s32.totalorder %s755_s25, 1 }
   0x9   : > { %p1088_p4 = por %p160_p2, %p159_p1  ;;  %s146_s29 = ssub.s32 %s1011_s22, %s1319_s26 }
   0xa   : > { %p758_p6 = scmp.ge.s32.totalorder %s1015_s23, 1  ;;  %p147_p7 = scmp.eq.s32.totalorder %s146_s29, 0 }
   0xb   : > { %p1095_p8 = por %p166_p5, %p165_p3  ;;  %p209_p9 = scmp.lt.s32.totalorder %s1015_s23, 3 }
   0xc   : > { %s1101_s6 = scalar_select %p147_p7, %s1003_s20, %s149_s27  }
   0xd   : > { %p210_p10 = pnand %p758_p6, %p209_p9 }
   0xe   : > { %p241_p11 = scmp.lt.s32.totalorder (!%p210_p10), %s1007_s21, 1  ;;  %s957_s7 = scalar_lea.hbm (!%p210_p10), %s1310_s5, 2 }
   0xf   : > { %213 = sbr.rel (%p210_p10) target bundleno = 427 (0x1ab), region = 40 }
  0x14   : > { %v293_v0 = vld [vmem:[%s1306_s1 + $0x10] sm:$0x3]  ;;  %vm442_vm0 = vcmask 1041408   ;;  %s242_s9 = scalar_select %p241_p11, %s1007_s21, 1  ;;  %v870_v4 = vld [vmem:[%s1306_s1 + $0x8] sm:$0xff]  ;;  %v869_v5 = vld [vmem:[%s1306_s1] sm:$0xff] }
  0x15   : > { %v387_v1 = vunpack.c.l.b16 %v293_v0  ;;  %vm393_vm1 = vcmask 293888   ;;  %v1166_v36 = vld [vmem:[%s1307_s2] ss:$0 sm:$0xff]  ;;  %vm568_vm2 = vcmask 130048   ;;  %vm255_vm3 = vcmask 122880  }
  0x16   : > { %s852_s12 = sshll.u32 %s242_s9, 7  ;;  %s238_s9 = sand.u32 1, %s999_s19  }
  0x17   : > { %v390_v2 = vpack.c.b16 %v387_v1, %v387_v1  ;;  %s1117_s17 = scalar_lea.vmem %s1305_s0, %s852_s12  ;;  %s681_s12 = scalar_lea.hbm %s1310_s5, %s1007_s21 }
  0x18   : > { %v853_v6 = vld [vmem:[%s1117_s17] sm:$0xff]  ;;  %v860_v7 = vld [vmem:[%s1117_s17 + $0x38] sm:$0xff]  ;;  %v854_v10 = vld [vmem:[%s1117_s17 + $0x8] sm:$0xff]  ;;  %s239_s15 = scalar_lea.vmem [#allocation3], %s238_s9  ;;  %s673_s24 = scalar_lea.sflag [#allocation4], %s238_s9 }
  0x19   : > { %v444_v3 = vsel %vm442_vm0, %v390_v2, 0  ;;  %v864_v8 = vld [vmem:[%s1117_s17 + $0x58] sm:$0xff]  ;;  %v857_v9 = vld [vmem:[%s1117_s17 + $0x20] sm:$0xff]  ;;  %v858_v13 = vld [vmem:[%s1117_s17 + $0x28] sm:$0xff]  ;;  %s683_s16 = sshll.u32 %s239_s15, 4  ;;  %s684_s16 = int_to_ptr.vmem [resolvable:$true] %s683_s16 }
  0x1a   : > { %451 = vmatpush.bf16.msra.mxu0 %v444_v3  ;;  %872 = vmatpush.bf16.msra.mxu2 %v444_v3  ;;  %v861_v11 = vld [vmem:[%s1117_s17 + $0x40] sm:$0xff]  ;;  %v855_v14 = vld [vmem:[%s1117_s17 + $0x10] sm:$0xff]  ;;  %v862_v15 = vld [vmem:[%s1117_s17 + $0x48] sm:$0xff] }
  0x1b   : > { %873 = vmatpush.bf16.msra.mxu3 %v444_v3  ;;  %871 = vmatpush.bf16.msra.mxu1 %v444_v3  ;;  %v865_v12 = vld [vmem:[%s1117_s17 + $0x60] sm:$0xff]  ;;  %v866_v16 = vld [vmem:[%s1117_s17 + $0x68] sm:$0xff]  ;;  %v859_v17 = vld [vmem:[%s1117_s17 + $0x30] sm:$0xff] }
  0x1c   : > { %v856_v18 = vld [vmem:[%s1117_s17 + $0x18] sm:$0xff]  ;;  %v863_v19 = vld [vmem:[%s1117_s17 + $0x50] sm:$0xff] }
  0x1d   : > { %v867_v20 = vld [vmem:[%s1117_s17 + $0x70] sm:$0xff]  ;;  %v868_v21 = vld [vmem:[%s1117_s17 + $0x78] sm:$0xff]  ;;  %s685_s17 = sshll.u32 %s681_s12, 4  ;;  %s686_s17 = int_to_ptr.hbm [resolvable:$true] %s685_s17 }
  0x1e   : > { %452 = vmatpush.bf16.msra.mxu0 %v870_v4  ;;  %875 = vmatpush.bf16.msra.mxu2 %v870_v4  ;;  %s951_s25 = sshra.s32 %s686_s17, 4  ;;  %s952_s25 = int_to_ptr.hbm [resolvable:$true] %s951_s25 }
  0x1f   : > { %876 = vmatpush.bf16.msra.mxu3 %v870_v4  ;;  %874 = vmatpush.bf16.msra.mxu1 %v870_v4  ;;  %s953_s27 = scalar_lea.hbm %s952_s25, 1  ;;  %p958_p1 = scmp.lt.s32.totalorder %s952_s25, %s1310_s5 }
  0x20   : > { %p954_p12 = scmp.ne.s32.totalorder %s952_s25, %s953_s27  ;;  %p959_p2 = scmp.lt.s32.totalorder %s957_s7, %s953_s27 }
  0x22   : > { %453 = vmatpush.bf16.msra.mxu0 %v869_v5  ;;  %878 = vmatpush.bf16.msra.mxu2 %v869_v5  ;;  %p955_p13 = pnand %p954_p12, %p1088_p4  ;;  %p960_p3 = por %p959_p2, %p958_p1 }
  0x23   : > { %879 = vmatpush.bf16.msra.mxu3 %v869_v5  ;;  %877 = vmatpush.bf16.msra.mxu1 %v869_v5 }
  0x24   : > { %p956_p0 = pneg %p955_p13 }
  0x25   : > { %833 = vmatmul.msk.bf16.vlgmr.msra.gmra.mxu0 %vm393_vm1, %v853_v6  ;;  %840 = vmatmul.msk.bf16.vlgmr.msra.gmra.mxu2 %vm393_vm1, %v860_v7 }
  0x26   : > { %844 = vmatmul.msk.bf16.vlgmr.msra.gmra.mxu3 %vm393_vm1, %v864_v8  ;;  %837 = vmatmul.msk.bf16.vlgmr.msra.gmra.mxu1 %vm393_vm1, %v857_v9  ;;  %p961_p5 = pnand %p960_p3, %p956_p0 }
  0x35   : > { %834 = vmatmul.msk.bf16.gmra.mxu0 %vm393_vm1, %v854_v10  ;;  %841 = vmatmul.msk.bf16.gmra.mxu2 %vm393_vm1, %v861_v11 }
  0x36   : > { %845 = vmatmul.msk.bf16.gmra.mxu3 %vm393_vm1, %v865_v12  ;;  %838 = vmatmul.msk.bf16.gmra.mxu1 %vm393_vm1, %v858_v13 }
  0x45   : > { %835 = vmatmul.msk.bf16.gmra.mxu0 %vm393_vm1, %v855_v14  ;;  %842 = vmatmul.msk.bf16.gmra.mxu2 %vm393_vm1, %v862_v15 }
  0x46   : > { %846 = vmatmul.msk.bf16.gmra.mxu3 %vm393_vm1, %v866_v16  ;;  %839 = vmatmul.msk.bf16.gmra.mxu1 %vm393_vm1, %v859_v17 }
  0x55   : > { %836 = vmatmul.msk.bf16.gmra.mxu0 %vm393_vm1, %v856_v18  ;;  %843 = vmatmul.msk.bf16.gmra.mxu2 %vm393_vm1, %v863_v19 }
  0x56   : > { %847 = vmatmul.msk.bf16.gmra.mxu3 %vm393_vm1, %v867_v20 }
  0x66   : > { %848 = vmatmul.msk.bf16.gmra.mxu3 %vm393_vm1, %v868_v21 }
  0xa2   : > { %v455_v22 = vpop.f32.mrf.mxu0 }
  0xa3   : > { %v475_v26 = vpop.f32.mrf.mxu1  ;;  %v456_v41 = vadd.f32 %v1166_v36, %v455_v22 }
  0xa4   : > { %v476_v3 = vadd.f32 %v1166_v36, %v475_v26 }
  0xa5   : > { %v535_v46 = vmax.f32 %v456_v41, 0.0 }
  0xa6   : > { %v543_v13 = vmax.f32 %v476_v3, 0.0 }
  0xa7   : > { %v569_v55 = vsel %vm568_vm2, %v535_v46, 0.0 }
  0xa8   : > { %v1151_v23 = vpop.f32.mrf.mxu2  ;;  %v584_v22 = vsel %vm568_vm2, %v543_v13, 0.0 }
  0xa9   : > { %v1153_v25 = vpop.f32.mrf.mxu3 }
  0xaa   : > { %v457_v24 = vpop.f32.mrf.mxu0 }
  0xab   : > { %v477_v30 = vpop.f32.mrf.mxu1  ;;  %v458_v39 = vadd.f32 %v1166_v36, %v457_v24 }
  0xac   : > { %v478_v7 = vadd.f32 %v1166_v36, %v477_v30 }
  0xad   : > { %v536_v44 = vmax.f32 %v458_v39, 0.0  ;;  %v491_v39 = vadd.f32 %v1166_v36, %v1151_v23 }
  0xae   : > { %v544_v17 = vmax.f32 %v478_v7, 0.0 }
  0xaf   : > { %v570_v49 = vsel %vm568_vm2, %v536_v44, 0.0 }
  0xb0   : > { %v1155_v28 = vpop.f32.mrf.mxu2  ;;  %v571_v59 = vadd.f32 %v570_v49, %v569_v55  ;;  %v586_v30 = vsel %vm568_vm2, %v544_v17, 0.0  ;;  %v549_v49 = vmax.f32 %v491_v39, 0.0 }
  0xb1   : > { %v1157_v29 = vpop.f32.mrf.mxu3 }
  0xb2   : > { %v460_v27 = vpop.f32.mrf.mxu0 }
  0xb3   : > { %v480_v35 = vpop.f32.mrf.mxu1  ;;  %v461_v42 = vadd.f32 %v1166_v36, %v460_v27 }
  0xb4   : > { %v481_v14 = vadd.f32 %v1166_v36, %v480_v35 }
  0xb5   : > { %v537_v47 = vmax.f32 %v461_v42, 0.0 }
  0xb6   : > { %v545_v24 = vmax.f32 %v481_v14, 0.0 }
  0xb7   : > { %v572_v56 = vsel %vm568_vm2, %v537_v47, 0.0 }
  0xb8   : > { %v1159_v32 = vpop.f32.mrf.mxu2  ;;  %v573_v62 = vadd.f32 %v572_v56, %v571_v59 }
  0xb9   : > { %v1161_v33 = vpop.f32.mrf.mxu3 }
  0xba   : > { %v462_v31 = vpop.f32.mrf.mxu0 }
  0xbb   : > { %v482_v43 = vpop.f32.mrf.mxu1  ;;  %v463_v45 = vadd.f32 %v1166_v36, %v462_v31 }
  0xbc   : > { %v483_v18 = vadd.f32 %v1166_v36, %v482_v43 }
  0xbd   : > { %v538_v50 = vmax.f32 %v463_v45, 0.0  ;;  %v493_v45 = vadd.f32 %v1166_v36, %v1155_v28  ;;  %v646_v28 = vld [vmem:[%s1308_s3 + $0x8] sm:$0xff] }
  0xbe   : > { %v546_v31 = vmax.f32 %v483_v18, 0.0  ;;  %665 = vmatpush.msrb.mxu1 %v646_v28 }
  0xbf   : > { %v574_v60 = vsel %vm568_vm2, %v538_v50, 0.0  ;;  %v496_v50 = vadd.f32 %v1166_v36, %v1159_v32 }
  0xc0   : > { %v1168_v37 = vpop.f32.mrf.mxu2  ;;  %v575_v2 = vadd.f32 %v574_v60, %v573_v62  ;;  %v590_v46 = vsel %vm568_vm2, %v546_v31, 0.0 }
  0xc1   : > { %v1170_v38 = vpop.f32.mrf.mxu3  ;;  %v498_v55 = vadd.f32 %v1166_v36, %v1168_v37  ;;  %v551_v59 = vmax.f32 %v496_v50, 0.0 }
  0xc2   : > { %v465_v34 = vpop.f32.mrf.mxu0 }
  0xc3   : > { %v466_v48 = vadd.f32 %v1166_v36, %v465_v34  ;;  %v485_v63 = vpop.f32.mrf.mxu1  ;;  %v552_v62 = vmax.f32 %v498_v55, 0.0  ;;  %v600_v3 = vsel %vm568_vm2, %v551_v59, 0.0 }
  0xc4   : > { %v486_v26 = vadd.f32 %v1166_v36, %v485_v63  ;;  %v1017_v63 = vmov 0.0  }
  0xc5   : > { %v539_v57 = vmax.f32 %v466_v48, 0.0  ;;  %256 = vst.msk [vmem:[#allocation2] sm:$0x1] %vm255_vm3, %v1017_v63 }
  0xc6   : > { %v547_v41 = vmax.f32 %v486_v26, 0.0  ;;  %v518_v26 = vadd.f32 %v1166_v36, %v1170_v38  ;;  %v645_v38 = vld [vmem:[%s1308_s3] sm:$0xff] }
  0xc7   : > { %v576_v0 = vsel %vm568_vm2, %v539_v57, 0.0  ;;  %666 = vmatpush.msrb.mxu1 %v645_v38 }
  0xc8   : > { %v1179_v52 = vpop.f32.mrf.mxu2  ;;  %v577_v5 = vadd.f32 %v576_v0, %v575_v2  ;;  %v592_v23 = vsel %vm568_vm2, %v547_v41, 0.0  ;;  %v560_v39 = vmax.f32 %v518_v26, 0.0 }
  0xc9   : > { %v1181_v54 = vpop.f32.mrf.mxu3  ;;  %v501_v32 = vadd.f32 %v1166_v36, %v1179_v52 }
  0xca   : > { %v467_v40 = vpop.f32.mrf.mxu0 }
  0xcb   : > { %v468_v51 = vadd.f32 %v1166_v36, %v467_v40  ;;  %v487_v21 = vpop.f32.mrf.mxu1  ;;  %v588_v40 = vsel %vm568_vm2, %v545_v24, 0.0 }
  0xcc   : > { %v488_v34 = vadd.f32 %v1166_v36, %v487_v21 }
  0xcd   : > { %v540_v61 = vmax.f32 %v468_v51, 0.0 }
  0xce   : > { %v548_v47 = vmax.f32 %v488_v34, 0.0  ;;  %v521_v34 = vadd.f32 %v1166_v36, %v1181_v54 }
  0xcf   : > { %v578_v4 = vsel %vm568_vm2, %v540_v61, 0.0 }
  0xd0   : > { %v579_v10 = vadd.f32 %v578_v4, %v577_v5  ;;  %v502_v11 = vpop.f32.mrf.mxu2  ;;  %v594_v56 = vsel %vm568_vm2, %v548_v47, 0.0  ;;  %v553_v4 = vmax.f32 %v501_v32, 0.0 }
  0xd1   : > { %v1193_v12 = vpop.f32.mrf.mxu3  ;;  %v503_v37 = vadd.f32 %v1166_v36, %v502_v11 }
  0xd2   : > { %v470_v53 = vpop.f32.mrf.mxu0  ;;  %v604_v11 = vsel %vm568_vm2, %v553_v4, 0.0 }
  0xd3   : > { %v471_v58 = vadd.f32 %v1166_v36, %v470_v53  ;;  %v550_v53 = vmax.f32 %v493_v45, 0.0  ;;  %v554_v7 = vmax.f32 %v503_v37, 0.0 }
  0xd5   : > { %v541_v1 = vmax.f32 %v471_v58, 0.0  ;;  %v596_v58 = vsel %vm568_vm2, %v549_v49, 0.0  ;;  %v598_v61 = vsel %vm568_vm2, %v550_v53, 0.0 }
  0xd7   : > { %v580_v8 = vsel %vm568_vm2, %v541_v1, 0.0 }
  0xd8   : > { %v581_v16 = vadd.f32 %v580_v8, %v579_v10  ;;  %v505_v43 = vpop.f32.mrf.mxu2  ;;  %v511_v10 = vadd.f32 %v1166_v36, %v1153_v25 }
  0xd9   : > { %v1205_v44 = vpop.f32.mrf.mxu3  ;;  %v506_v5 = vadd.f32 %v1166_v36, %v505_v43  ;;  %v561_v43 = vmax.f32 %v521_v34, 0.0 }
  0xda   : > { %v472_v6 = vpop.f32.mrf.mxu0  ;;  %v526_v45 = vadd.f32 %v1166_v36, %v1205_v44 }
  0xdb   : > { %v473_v9 = vadd.f32 %v1166_v36, %v472_v6  ;;  %v602_v6 = vsel %vm568_vm2, %v552_v62, 0.0  ;;  %v555_v13 = vmax.f32 %v506_v5, 0.0  ;;  %v620_v50 = vsel %vm568_vm2, %v561_v43, 0.0  ;;  %v567_v5 = vld [vmem:[#allocation2] sm:$0x1] }
  0xdd   : > { %v542_v15 = vmax.f32 %v473_v9, 0.0  ;;  %v608_v21 = vsel %vm568_vm2, %v555_v13, 0.0 }
  0xdf   : > { %v582_v19 = vsel %vm568_vm2, %v542_v15, 0.0  ;;  %v513_v15 = vadd.f32 %v1166_v36, %v1157_v29 }
  0xe0   : > { %v583_v20 = vadd.f32 %v582_v19, %v581_v16  ;;  %v507_v1 = vpop.f32.mrf.mxu2  ;;  %v606_v16 = vsel %vm568_vm2, %v554_v7, 0.0  ;;  %v557_v19 = vmax.f32 %v511_v10, 0.0 }
  0xe1   : > { %v527_v2 = vpop.f32.mrf.mxu3  ;;  %v508_v8 = vadd.f32 %v1166_v36, %v507_v1  ;;  %v558_v25 = vmax.f32 %v513_v15, 0.0 }
  0xe2   : > { %v585_v27 = vadd.f32 %v584_v22, %v583_v20  ;;  %v516_v20 = vadd.f32 %v1166_v36, %v1161_v33  ;;  %v612_v29 = vsel %vm568_vm2, %v557_v19, 0.0 }
  0xe3   : > { %v556_v17 = vmax.f32 %v508_v8, 0.0  ;;  %v614_v33 = vsel %vm568_vm2, %v558_v25, 0.0  ;;  %v647_v8 = vld [vmem:[%s1309_s4] sm:$0x1] }
  0xe4   : > { %v587_v35 = vadd.f32 %v586_v30, %v585_v27  ;;  %v559_v31 = vmax.f32 %v516_v20, 0.0 }
  0xe5   : > { %v610_v27 = vsel %vm568_vm2, %v556_v17, 0.0 }
  0xe6   : > { %v589_v42 = vadd.f32 %v588_v40, %v587_v35  ;;  %v523_v40 = vadd.f32 %v1166_v36, %v1193_v12 }
  0xe8   : > { %v591_v48 = vadd.f32 %v590_v46, %v589_v42  ;;  %v616_v42 = vsel %vm568_vm2, %v559_v31, 0.0  ;;  %v618_v46 = vsel %vm568_vm2, %v560_v39, 0.0  ;;  %v562_v47 = vmax.f32 %v523_v40, 0.0 }
  0xe9   : > { %v530_v24 = vpop.f32.mrf.mxu3 }
  0xea   : > { %v593_v51 = vadd.f32 %v592_v23, %v591_v48  ;;  %v528_v48 = vadd.f32 %v1166_v36, %v527_v2  ;;  %v563_v23 = vmax.f32 %v526_v45, 0.0  ;;  %v622_v55 = vsel %vm568_vm2, %v562_v47, 0.0 }
  0xec   : > { %v595_v57 = vadd.f32 %v594_v56, %v593_v51  ;;  %v531_v51 = vadd.f32 %v1166_v36, %v530_v24  ;;  %v564_v56 = vmax.f32 %v528_v48, 0.0  ;;  %v624_v28 = vsel %vm568_vm2, %v563_v23, 0.0 }
  0xee   : > { %v597_v60 = vadd.f32 %v596_v58, %v595_v57  ;;  %v565_v58 = vmax.f32 %v531_v51, 0.0  ;;  %v626_v32 = vsel %vm568_vm2, %v564_v56, 0.0 }
  0xf0   : > { %v599_v0 = vadd.f32 %v598_v61, %v597_v60  ;;  %v628_v62 = vsel %vm568_vm2, %v565_v58, 0.0 }
  0xf1   : > { %v532_v12 = vpop.f32.mrf.mxu3 }
  0xf2   : > { %v601_v52 = vadd.f32 %v600_v3, %v599_v0  ;;  %v533_v44 = vadd.f32 %v1166_v36, %v532_v12 }
  0xf4   : > { %v603_v9 = vadd.f32 %v602_v6, %v601_v52  ;;  %v566_v60 = vmax.f32 %v533_v44, 0.0 }
  0xf6   : > { %v605_v14 = vadd.f32 %v604_v11, %v603_v9  ;;  %v630_v63 = vsel %vm568_vm2, %v566_v60, 0.0 }
  0xf8   : > { %v607_v18 = vadd.f32 %v606_v16, %v605_v14 }
  0xfa   : > { %v609_v22 = vadd.f32 %v608_v21, %v607_v18 }
  0xfc   : > { %v611_v30 = vadd.f32 %v610_v27, %v609_v22 }
  0xfe   : > { %v613_v35 = vadd.f32 %v612_v29, %v611_v30 }
 0x100   : > { %v615_v41 = vadd.f32 %v614_v33, %v613_v35 }
 0x102   : > { %v617_v54 = vadd.f32 %v616_v42, %v615_v41 }
 0x104   : > { %v619_v49 = vadd.f32 %v618_v46, %v617_v54 }
 0x106   : > { %v621_v53 = vadd.f32 %v620_v50, %v619_v49 }
 0x108   : > { %v623_v57 = vadd.f32 %v622_v55, %v621_v53 }
 0x10a   : > { %v625_v59 = vadd.f32 %v624_v28, %v623_v57 }
 0x10c   : > { %v627_v61 = vadd.f32 %v626_v32, %v625_v59 }
 0x10e   : > { %v629_v37 = vadd.f32 %v628_v62, %v627_v61 }
 0x110   : > { %v631_v0 = vadd.f32 %v630_v63, %v629_v37 }
 0x112   : > { %v632_v1 = vrot.slane %v631_v0, 4 }
 0x114   : > { %v633_v2 = vadd.f32 %v632_v1, %v631_v0 }
 0x116   : > { %v634_v36 = vrot.slane %v633_v2, 2 }
 0x118   : > { %v635_v3 = vadd.f32 %v634_v36, %v633_v2 }
 0x11a   : > { %v636_v4 = vrot.slane %v635_v3, 1 }
 0x11c   : > { %v637_v52 = vadd.f32 %v636_v4, %v635_v3 }
 0x11e   : > { %v638_v6 = vadd.f32 %v637_v52, %v567_v5 }
 0x120   : > { %640 = vst.msk [vmem:[#allocation2] sm:$0x1] %vm255_vm3, %v638_v6 }
 0x127   : > { %v644_v7 = vld [vmem:[#allocation2] sm:$0x1] }
 0x128   : > { %849 = vmatmul.msk.f32.vlgmr.msrb.gmra.mxu1 %vm568_vm2, %v644_v7 }
 0x1a5   : > { %v668_v9 = vpop.f32.mrf.mxu1 }
 0x1a6   : > { %v669_v10 = vadd.f32 %v668_v9, %v647_v8 }
 0x1a8   : > { %671 = vst [vmem:[%s239_s15] sm:$0x1] %v669_v10 }
 0x1a9   : > { %964 = shalt.err (!%p961_p5)
}
 0x1aa   : > { %880 = dma.vmem_to_hbm [thread:$0]  (%p1088_p4), %s684_s16, 16, %s686_s17, %s673_s24  }
 0x1ab PF: > { %p886_p6 = scmp.ge.s32.totalorder %s1015_s23, 2  ;;  %s697_s9 = sand.u32 1, %s995_s18  }
 0x1ac   : > { %s698_s11 = scalar_lea.sflag [#allocation4], %s697_s9 }
 0x1ad   : > { %p883_p7 = pnand %p886_p6, %p1095_p8 }
 0x1af   : > { %p884_p9 = pneg %p883_p7 }
 0x1b1   : > { %990 = dma.done.wait (%p884_p9), %s698_s11, 16  }
 0x1b2   : > { %992 = vsyncadd (%p884_p9), %s698_s11, 4294967280  ;;  %s18_s23 = sadd.s32 1, %s1015_s23   ;;  %s1313_s18 = smov %s999_s19 }
 0x1b3   : > { %p15_p10 = scmp.ge.s32.totalorder %s18_s23, 4   ;;  %s1314_s19 = smov %s1003_s20 }
 0x1b4   : > { %s1315_s20 = smov %s1101_s6  ;;  %s1316_s21 = smov %s1011_s22 }
 0x1b5   : > { %s1317_s22 = smov %s1319_s26  ;;  %17 = sbr.rel (!%p15_p10) target bundleno = 4 (0x4), region = 83 }
 0x1ba   :  { %703 = vsyncpa [#allocation4], 1 }
 0x1bb   :  { %705 = vsyncpa [#allocation4 + $0x1], 1 }

</bundles_post_ra>
